<compile_context>
chip_gen: v5e
topology: v5e:2x2
jax: 0.10.0
libtpu: 0.0.40
codegen_flags: <defaults>
</compile_context>

<pallas_src>
import jax
import jax.numpy as jnp
from jax.experimental import pallas as pl
from jax.experimental.pallas import tpu as pltpu


def _round_up(x, m):
    return (x + m - 1) // m * m


def _rbf_kernel(x_ref, p_ref, pc_ref, cq_ref, w_ref, o_ref):
    x = x_ref[...]        # (tm, F)  batch tile (f32 or bf16 MXU operand)
    p = p_ref[...]        # (F, F)   -0.5 * P  (symmetric), grid-invariant
    pc = pc_ref[...]      # (F, C)   P @ centers.T,          grid-invariant
    cq = cq_ref[...]      # (1, C)   -0.5 * diag(C P C^T), f32, grid-invariant
    w = w_ref[...]        # (C, O)   output weights

    # exponent = -0.5*(x-c) P (x-c)^T = x(-0.5P)x + x(PC^T) + (-0.5 cPc)
    xp = jnp.dot(x, p, preferred_element_type=jnp.float32)        # (tm, F)
    xq = jnp.sum(xp * x.astype(jnp.float32), axis=-1, keepdims=True)  # (tm, 1)
    cross = jnp.dot(x, pc, preferred_element_type=jnp.float32)    # (tm, C)
    expo = xq + cross + cq                                        # f32 assembly
    # P is PSD so the true exponent is <= 0; clamp cancellation-induced
    # positives from the expanded quadratic form.
    expo = jnp.minimum(expo, 0.0)
    phi = jnp.exp(expo)                                           # (tm, C), f32

    logits = jnp.dot(phi.astype(w.dtype), w,
                     preferred_element_type=jnp.float32)          # (tm, O)

    # Softmax along the last dim (no padded lanes -> no masking needed).
    m = jnp.max(logits, axis=-1, keepdims=True)
    e = jnp.exp(logits - m)
    s = jnp.sum(e, axis=-1, keepdims=True)
    inv = pl.reciprocal(s, approx=True)       # EUP slot (free alongside VALU)
    inv = inv * (2.0 - s * inv)               # one Newton step -> full f32 acc
    o_ref[...] = (e * inv).astype(o_ref.dtype)


def rbf_forward(x, centers, precision_elements, weights, *,
                tm_max=512, mxu_dtype=jnp.float32):
    """Fused RBF-network forward.

    Precision-matrix construction + grid-invariant center work is done once in
    the JAX wrapper.  mxu_dtype=jnp.bfloat16 feeds the MXU at full rate on
    v6e/v7x (f32 accumulation, f32 exponent assembly); default f32 is exact.
    """
    N, F = x.shape
    C, Fc = centers.shape
    assert F == Fc
    O = weights.shape[1]

    # Build lower-triangular L from packed elements (torch.tril_indices
    # ordering == jnp.tril_indices: row-major over the lower triangle).
    rows, cols = jnp.tril_indices(F)
    L = jnp.zeros((F, F), jnp.float32).at[rows, cols].set(
        precision_elements.astype(jnp.float32))
    P = L @ L.T
    c32 = centers.astype(jnp.float32)

    # Hoisted, grid-invariant operands with the -0.5 scalars folded in.
    p_arg = (-0.5 * P).astype(mxu_dtype)                              # (F, F)
    pc = (P @ c32.T).astype(mxu_dtype)                                # (F, C)
    cq = (-0.5 * jnp.sum((c32 @ P) * c32, axis=-1))[None, :]          # (1, C) f32
    w_arg = weights.astype(mxu_dtype)                                 # (C, O)
    x_arg = x.astype(mxu_dtype)                                       # (N, F)

    # Batch tile: multiple of 8, capped at tm_max, and sized so there are at
    # least 2 grid steps whenever N allows it (v7x: shard across both TCs).
    tm = max(8, min(tm_max, _round_up(-(-N // 2), 8)))
    Np = _round_up(N, tm)
    if Np != N:  # only materialize a padded copy of X when actually required
        x_arg = jnp.pad(x_arg, ((0, Np - N), (0, 0)))
    grid = (Np // tm,)

    # VMEM budget: X/out tiles double-buffered + single-buffered invariants,
    # each rounded up to the (8,128) layout tile; 2x headroom, capped at 64 MiB
    # so the limit is valid on v5e/v6e (128 MiB) and v7x (64 MiB) alike.
    isz = jnp.dtype(mxu_dtype).itemsize

    def _buf_bytes(r, c, b):
        return _round_up(r, 8) * _round_up(c, 128) * b

    needed = (2 * _buf_bytes(tm, F, isz)        # X tile, double-buffered
              + 2 * _buf_bytes(tm, O, 4)        # out tile, double-buffered
              + _buf_bytes(F, F, isz)           # -0.5 * P      (Buffered(1))
              + _buf_bytes(F, C, isz)           # P @ C^T       (Buffered(1))
              + _buf_bytes(1, C, 4)             # -0.5 diag     (Buffered(1))
              + _buf_bytes(C, O, isz))          # W             (Buffered(1))
    vmem_limit = int(min(64 << 20, max(32 << 20, 2 * needed + (2 << 20))))

    out = pl.pallas_call(
        _rbf_kernel,
        out_shape=jax.ShapeDtypeStruct((Np, O), jnp.float32),
        grid_spec=pltpu.PrefetchScalarGridSpec(
            num_scalar_prefetch=0,
            grid=grid,
            in_specs=[
                # Batch-tiled X (feature dim at true width = full array dim).
                pl.BlockSpec((tm, F), lambda i: (i, 0)),
                # Grid-invariant operands: constant index_map -> single buffer.
                pl.BlockSpec((F, F), lambda i: (0, 0),
                             pipeline_mode=pl.Buffered(buffer_count=1)),
                pl.BlockSpec((F, C), lambda i: (0, 0),
                             pipeline_mode=pl.Buffered(buffer_count=1)),
                pl.BlockSpec((1, C), lambda i: (0, 0),
                             pipeline_mode=pl.Buffered(buffer_count=1)),
                pl.BlockSpec((C, O), lambda i: (0, 0),
                             pipeline_mode=pl.Buffered(buffer_count=1)),
            ],
            out_specs=pl.BlockSpec((tm, O), lambda i: (i, 0)),
        ),
        compiler_params=pltpu.CompilerParams(
            dimension_semantics=("parallel",),
            vmem_limit_bytes=vmem_limit),
    )(x_arg, p_arg, pc, cq, w_arg)

    return out[:N]


def rbf_forward_ref(x, centers, precision_elements, weights):
    """Pure-JAX reference matching the PyTorch forward exactly."""
    F = x.shape[1]
    rows, cols = jnp.tril_indices(F)
    L = jnp.zeros((F, F), jnp.float32).at[rows, cols].set(precision_elements)
    P = L @ L.T
    diff = x[:, None, :] - centers[None, :, :]                     # (N, C, F)
    q = jnp.einsum('ijk,kl,ijl->ij', diff, P, diff)
    phi = jnp.exp(-0.5 * q)
    logits = phi @ weights
    return jax.nn.softmax(logits, axis=-1)


if __name__ == "__main__":
    # Small shapes consistent with the module: N batch samples, F features,
    # C centers, O outputs.
    # NOTE: the original module references self.n_outputs without defining it;
    # we pick n_outputs = 8 for this synthetic instantiation.
    N, F, C, O = 16, 8, 32, 8

    key = jax.random.PRNGKey(0)
    k_x, k_pe, k_c, k_w = jax.random.split(key, 4)

    x = jax.random.normal(k_x, (N, F), jnp.float32)
    precision_elements = jax.random.normal(k_pe, (F * (F + 1) // 2,), jnp.float32)
    centers = jax.random.normal(k_c, (C, F), jnp.float32)
    weights = jax.random.normal(k_w, (C, O), jnp.float32)

    y_ref = rbf_forward_ref(x, centers, precision_elements, weights)

    # Exact (f32 MXU operand) path — must match the reference tightly.
    y = jax.block_until_ready(
        rbf_forward(x, centers, precision_elements, weights))
    assert y.shape == (N, O)
    assert jnp.allclose(y, y_ref, atol=2e-5, rtol=2e-5), (
        f"max abs err {jnp.max(jnp.abs(y - y_ref))}")

    # bf16-MXU-operand path (full-rate MXU on v6e/v7x, f32 accumulation and
    # f32 exponent assembly).  bf16 operand rounding means only a loose
    # sanity check is meaningful against the f32 reference.
    y_bf = jax.block_until_ready(
        rbf_forward(x, centers, precision_elements, weights,
                    mxu_dtype=jnp.bfloat16))
    assert y_bf.shape == (N, O)
    assert bool(jnp.all(jnp.isfinite(y_bf)))
    assert jnp.allclose(jnp.sum(y_bf, axis=-1), 1.0, atol=1e-3)

    print("KERNEL_OK")
</pallas_src>

<mosaic_0001>
module attributes {stable_mosaic.version = 11 : i64} {
  func.func @_rbf_kernel(%arg0: i32, %arg1: memref<8x8xf32, #tpu.memory_space<vmem>>, %arg2: memref<8x8xf32, #tpu.memory_space<vmem>>, %arg3: memref<8x32xf32, #tpu.memory_space<vmem>>, %arg4: memref<1x32xf32, #tpu.memory_space<vmem>>, %arg5: memref<32x8xf32, #tpu.memory_space<vmem>>, %arg6: memref<8x8xf32, #tpu.memory_space<vmem>>) attributes {dimension_semantics = [#tpu.dimension_semantics<parallel>], iteration_bounds = array<i64: 2>, scalar_prefetch = 0 : i64, scratch_operands = 0 : i64, tpu.core_type = #tpu.core_type<tc>, window_params = [{transform_indices = @transform_0, window_bounds = array<i64: 8, 8>}, {pipeline_mode = #tpu.pipeline_mode<synchronous>, transform_indices = @transform_1, window_bounds = array<i64: 8, 8>}, {pipeline_mode = #tpu.pipeline_mode<synchronous>, transform_indices = @transform_2, window_bounds = array<i64: 8, 32>}, {pipeline_mode = #tpu.pipeline_mode<synchronous>, transform_indices = @transform_3, window_bounds = array<i64: 1, 32>}, {pipeline_mode = #tpu.pipeline_mode<synchronous>, transform_indices = @transform_4, window_bounds = array<i64: 32, 8>}, {transform_indices = @transform_5, window_bounds = array<i64: 8, 8>}]} {
    %c0 = arith.constant 0 : index
    %c0_0 = arith.constant 0 : index
    %0 = vector.load %arg1[%c0, %c0_0] : memref<8x8xf32, #tpu.memory_space<vmem>>, vector<8x8xf32>
    %c0_1 = arith.constant 0 : index
    %c0_2 = arith.constant 0 : index
    %1 = vector.load %arg2[%c0_1, %c0_2] : memref<8x8xf32, #tpu.memory_space<vmem>>, vector<8x8xf32>
    %c0_3 = arith.constant 0 : index
    %c0_4 = arith.constant 0 : index
    %2 = vector.load %arg3[%c0_3, %c0_4] : memref<8x32xf32, #tpu.memory_space<vmem>>, vector<8x32xf32>
    %c0_5 = arith.constant 0 : index
    %c0_6 = arith.constant 0 : index
    %3 = vector.load %arg4[%c0_5, %c0_6] : memref<1x32xf32, #tpu.memory_space<vmem>>, vector<1x32xf32>
    %c0_7 = arith.constant 0 : index
    %c0_8 = arith.constant 0 : index
    %4 = vector.load %arg5[%c0_7, %c0_8] : memref<32x8xf32, #tpu.memory_space<vmem>>, vector<32x8xf32>
    %cst = arith.constant dense<0.000000e+00> : vector<8x8xf32>
    %5 = tpu.matmul %0, %1, %cst {dimension_numbers = #tpu.dot_dimension_numbers<[1], [0], [0], [1], [0, 0, 1, 1], [], []>} : vector<8x8xf32>, vector<8x8xf32>, vector<8x8xf32> -> vector<8x8xf32>
    %6 = arith.mulf %5, %0 : vector<8x8xf32>
    %cst_9 = arith.constant dense<0.000000e+00> : vector<8xf32>
    %7 = vector.multi_reduction <add>, %6, %cst_9 [1] : vector<8x8xf32> to vector<8xf32>
    %8 = vector.shape_cast %7 : vector<8xf32> to vector<8x1xf32>
    %cst_10 = arith.constant dense<0.000000e+00> : vector<8x32xf32>
    %9 = tpu.matmul %0, %2, %cst_10 {dimension_numbers = #tpu.dot_dimension_numbers<[1], [0], [0], [1], [0, 0, 1, 1], [], []>} : vector<8x8xf32>, vector<8x32xf32>, vector<8x32xf32> -> vector<8x32xf32>
    %10 = vector.broadcast %8 : vector<8x1xf32> to vector<8x32xf32>
    %11 = arith.addf %10, %9 : vector<8x32xf32>
    %12 = vector.broadcast %3 : vector<1x32xf32> to vector<8x32xf32>
    %13 = arith.addf %11, %12 : vector<8x32xf32>
    %cst_11 = arith.constant 0.000000e+00 : f32
    %14 = vector.broadcast %cst_11 : f32 to vector<8x32xf32>
    %15 = arith.minimumf %13, %14 : vector<8x32xf32>
    %16 = math.exp %15 : vector<8x32xf32>
    %cst_12 = arith.constant dense<0.000000e+00> : vector<8x8xf32>
    %17 = tpu.matmul %16, %4, %cst_12 {dimension_numbers = #tpu.dot_dimension_numbers<[1], [0], [0], [1], [0, 0, 1, 1], [], []>} : vector<8x32xf32>, vector<32x8xf32>, vector<8x8xf32> -> vector<8x8xf32>
    %cst_13 = arith.constant dense<0xFF800000> : vector<8xf32>
    %18 = vector.multi_reduction <maximumf>, %17, %cst_13 [1] : vector<8x8xf32> to vector<8xf32>
    %19 = vector.shape_cast %18 : vector<8xf32> to vector<8x1xf32>
    %20 = vector.broadcast %19 : vector<8x1xf32> to vector<8x8xf32>
    %21 = arith.subf %17, %20 : vector<8x8xf32>
    %22 = math.exp %21 : vector<8x8xf32>
    %cst_14 = arith.constant dense<0.000000e+00> : vector<8xf32>
    %23 = vector.multi_reduction <add>, %22, %cst_14 [1] : vector<8x8xf32> to vector<8xf32>
    %24 = vector.shape_cast %23 : vector<8xf32> to vector<8x1xf32>
    %25 = tpu.reciprocal %24 {approx = true} : vector<8x1xf32> -> vector<8x1xf32>
    %26 = arith.mulf %24, %25 : vector<8x1xf32>
    %cst_15 = arith.constant 2.000000e+00 : f32
    %27 = vector.broadcast %cst_15 : f32 to vector<8x1xf32>
    %28 = arith.subf %27, %26 : vector<8x1xf32>
    %29 = arith.mulf %25, %28 : vector<8x1xf32>
    %30 = vector.broadcast %29 : vector<8x1xf32> to vector<8x8xf32>
    %31 = arith.mulf %22, %30 : vector<8x8xf32>
    %c0_16 = arith.constant 0 : index
    %c0_17 = arith.constant 0 : index
    %32 = vector.load %arg6[%c0_16, %c0_17] : memref<8x8xf32, #tpu.memory_space<vmem>>, vector<8x8xf32>
    tpu.vector_store %arg6[%c0_16, %c0_17], %31 {strides = array<i32>} : memref<8x8xf32, #tpu.memory_space<vmem>>, vector<8x8xf32>,
    return
  }
  func.func @transform_0(%arg0: i32) -> (i32, i32) {
    %c0_i32 = arith.constant 0 : i32
    %c0_i32_0 = arith.constant 0 : i32
    return %arg0, %c0_i32 : i32, i32
  }
  func.func @transform_1(%arg0: i32) -> (i32, i32) {
    %c0_i32 = arith.constant 0 : i32
    %c0_i32_0 = arith.constant 0 : i32
    %c0_i32_1 = arith.constant 0 : i32
    return %c0_i32, %c0_i32_0 : i32, i32
  }
  func.func @transform_2(%arg0: i32) -> (i32, i32) {
    %c0_i32 = arith.constant 0 : i32
    %c0_i32_0 = arith.constant 0 : i32
    %c0_i32_1 = arith.constant 0 : i32
    return %c0_i32, %c0_i32_0 : i32, i32
  }
  func.func @transform_3(%arg0: i32) -> (i32, i32) {
    %c0_i32 = arith.constant 0 : i32
    %c0_i32_0 = arith.constant 0 : i32
    %c0_i32_1 = arith.constant 0 : i32
    return %c0_i32, %c0_i32_0 : i32, i32
  }
  func.func @transform_4(%arg0: i32) -> (i32, i32) {
    %c0_i32 = arith.constant 0 : i32
    %c0_i32_0 = arith.constant 0 : i32
    %c0_i32_1 = arith.constant 0 : i32
    return %c0_i32, %c0_i32_0 : i32, i32
  }
  func.func @transform_5(%arg0: i32) -> (i32, i32) {
    %c0_i32 = arith.constant 0 : i32
    %c0_i32_0 = arith.constant 0 : i32
    return %arg0, %c0_i32 : i32, i32
  }
}

</mosaic_0001>

<bundles_post_ra>
// kernel: tpu_custom_call.1
= control target key start
LH: loop header
LB: loop body
LE: loop exit
PB: predicated region body
PF: predicated region fallthrough
CT: control target
= control target key end

     0   :  { %s441_s18 = smov 0   ;;  %s492_s0 = inlined_call_operand.vmem [shape: f32[16,8], index: 0, kind: input, shape index: {}]   ;;  %s493_s1 = inlined_call_operand.vmem [shape: f32[8,8], index: 1, kind: input, shape index: {}]   ;;  %s494_s2 = inlined_call_operand.vmem [shape: f32[8,32], index: 2, kind: input, shape index: {}]   ;;  %s495_s3 = inlined_call_operand.vmem [shape: f32[1,32], index: 3, kind: input, shape index: {}]   ;;  %s496_s4 = inlined_call_operand.vmem [shape: f32[32,8], index: 4, kind: input, shape index: {}]   ;;  %s497_s5 = inlined_call_operand.vmem [shape: f32[16,8], index: 5, kind: output, shape index: {}]  }
   0x1 LB: > { %s376_s19 = sadd.s32 4294967295, %s409_s18   ;;  %p380_p0 = scmp.ge.s32.totalorder %s409_s18, 1  ;;  %s409_s18 = sphi %s441_s18, %s15_s18  }
   0x2   : > { %p186_p1 = scmp.lt.s32.totalorder %s409_s18, 3 }
   0x4   : > { %p187_p2 = pnand %p380_p0, %p186_p1 }
   0x5   : > { %p212_p3 = scmp.lt.s32.totalorder (!%p187_p2), %s376_s19, 1 }
   0x6   : > { %190 = sbr.rel (%p187_p2) target bundleno = 668 (0x29c), region = 40 }
   0xb   : > { %v221_v0 = vld [vmem:[%s493_s1] sm:$0xff]  ;;  %s499_s19 = smov (!%p212_p3, %s376_s19), 1  ;;  %vm228_vm0 = vcmask 64512   ;;  %v227_v6 = vld [vmem:[%s496_s4 + $0x18] sm:$0xff]  ;;  %v226_v7 = vld [vmem:[%s496_s4 + $0x10] sm:$0xff]  ;;  %vm284_vm1 = vcmask 261120  }
   0xc   : > { %v222_v1 = vld [vmem:[%s494_s2] sm:$0xff]  ;;  %247 = vmatpush.msra.mxu0 %v221_v0  ;;  %s381_s24 = sshll.u32 %s499_s19, 3  ;;  %300 = vmatpush.msra.mxu2 %v227_v6  ;;  %v225_v8 = vld [vmem:[%s496_s4 + $0x8] sm:$0xff] }
   0xd   : > { %271 = vmatpush.msra.mxu1 %v222_v1  ;;  %s215_s27 = scalar_lea.vmem %s492_s0, %s381_s24  ;;  %v224_v9 = vld [vmem:[%s496_s4] sm:$0xff]  ;;  %s219_s15 = scalar_lea.vmem %s497_s5, %s381_s24 }
   0xe   : > { %v220_v2 = vld [vmem:[%s215_s27] sm:$0xff]  ;;  %301 = vmatpush.msra.mxu2 %v226_v7 }
   0xf   : > { %383 = vmatmul.msk.f32.vlgmr.msra.gmra.mxu0 %vm228_vm0, %v220_v2  ;;  %384 = vmatmul.msk.f32.vlgmr.msra.gmra.mxu1 %vm228_vm0, %v220_v2  ;;  %v396_v11 = vld [vmem:[%s495_s3] ss:$0 sm:$0xff] }
  0x10   : > { %302 = vmatpush.msra.mxu2 %v225_v8 }
  0x12   : > { %303 = vmatpush.msra.mxu2 %v224_v9 }
  0x8c   : > { %v249_v3 = vpop.f32.mrf.mxu0  ;;  %v273_v10 = vpop.f32.mrf.mxu1 }
  0x8d   : > { %v252_v4 = vmul.f32 %v249_v3, %v220_v2 }
  0x8f   : > { %v253_v5 = vsel %vm228_vm0, %v252_v4, 0.0 }
  0x90   : > { %254 = vadd.xlane.f32.xlu0 %v253_v5 }
 0x103   : > { %v255_v12 = vpop.xlane.xlu0 %254 }
 0x104   : > { %v276_v13 = vadd.f32 %v273_v10, %v255_v12 }
 0x106   : > { %v280_v14 = vadd.f32 %v396_v11, %v276_v13 }
 0x108   : > { %v281_v15 = vmin.f32 %v280_v14, 0.0 }
 0x10a   : > { %v282_v16 = vmul.f32 1.442695, %v281_v15 }
 0x10c   : > { %397 = vpow2.f32 %v282_v16 }
 0x112   : > { %v398_v17 = vpop.eup %397 }
 0x113   : > { %385 = vmatmul.msk.f32.vlgmr.msra.gmra.mxu2 %vm284_vm1, %v398_v17 }
 0x196   : > { %v305_v18 = vpop.f32.mrf.mxu2 }
 0x197   : > { %v308_v19 = vsel %vm228_vm0, %v305_v18, -inf }
 0x198   : > { %309 = vmax.xlane.f32.xlu0 %v308_v19 }
 0x20b   : > { %v310_v20 = vpop.xlane.xlu0 %309 }
 0x20c   : > { %v311_v21 = vsub.f32 %v305_v18, %v310_v20 }
 0x20e   : > { %v312_v22 = vmul.f32 1.442695, %v311_v21 }
 0x210   : > { %399 = vpow2.f32 %v312_v22 }
 0x216   : > { %v400_v23 = vpop.eup %399 }
 0x217   : > { %v314_v24 = vsel %vm228_vm0, %v400_v23, 0.0 }
 0x218   : > { %315 = vadd.xlane.f32.xlu1 %v314_v24 }
 0x28b   : > { %v316_v25 = vpop.xlane.xlu1 %315 }
 0x28c   : > { %401 = vrcp.f32 %v316_v25 }
 0x292   : > { %v402_v26 = vpop.eup %401 }
 0x293   : > { %v318_v27 = vmul.f32 %v402_v26, %v316_v25 }
 0x295   : > { %v319_v28 = vsub.f32 2.0, %v318_v27 }
 0x297   : > { %v320_v29 = vmul.f32 %v402_v26, %v319_v28 }
 0x299   : > { %v321_v30 = vmul.f32 %v400_v23, %v320_v29 }
 0x29b   : > { %322 = vst.msk [vmem:[%s219_s15] sm:$0xff] %vm228_vm0, %v321_v30 }
 0x29c PF: > { %s15_s18 = sadd.s32 1, %s409_s18  }
 0x29d   : > { %p12_p4 = scmp.ge.s32.totalorder %s15_s18, 4  }
 0x29f   :  { %14 = sbr.rel (!%p12_p4) target bundleno = 1 (0x1), region = 70 }

</bundles_post_ra>
